<compile_context>
chip_gen: v7x
topology: tpu7x:2x2x1
jax: 0.10.0
libtpu: 0.0.40
codegen_flags: <defaults>
</compile_context>

<pallas_src>
import jax
import jax.numpy as jnp
from jax.experimental import pallas as pl
from jax.experimental.pallas import tpu as pltpu

EPS = 1e-5


def _dualconv_kernel(x_ref, t1_ref, g1_ref, be1_ref, t2_ref, g2_ref, be2_ref,
                     foldm_ref, unfold_ref, o_ref):
    N, H, _ = x_ref.shape                    # x: (N, H, W*Cin), f32, no halo
    NH, WCo = o_ref.shape                    # out: (N*H, W*Cout), lane-dense

    def conv3x3(v3d, t_ref):
        """3x3 'SAME' conv as ONE fused MXU contraction.

        v3d: (N, H, K) f32 activations.  The three vertical taps
        [row h-1 | row h | row h+1] are stacked along lanes with zero rows at
        the per-image borders (vertical padding lives in registers); the
        horizontal taps + horizontal padding live in the K-stacked
        width-Toeplitz weights t_ref of shape (3*K, W*Cout).  bf16 operands,
        f32 accumulation.
        """
        n, h, k = v3d.shape
        zrow = jnp.zeros((n, 1, k), v3d.dtype)
        up = jnp.concatenate([zrow, v3d[:, :h - 1, :]], axis=1)   # row h-1 (dy=0)
        dn = jnp.concatenate([v3d[:, 1:, :], zrow], axis=1)       # row h+1 (dy=2)
        taps = jnp.concatenate([up, v3d, dn], axis=-1)            # (n, h, 3k)
        taps = taps.reshape(n * h, 3 * k).astype(t_ref.dtype)     # bf16 MXU operand
        return jnp.dot(taps, t_ref[...], preferred_element_type=jnp.float32)

    def bn_relu(y, g_ref, be_ref):
        """Training-mode BatchNorm (biased variance) + ReLU, single pass.

        Lane sums / sums-of-squares are folded to per-channel stats with ONE
        stacked (2, W*Co) @ (W*Co, Co) matmul (fold matrix carries 1/M), the
        fused affine (a, b) is broadcast back to the lane layout with ONE
        stacked (2, Co) @ (Co, W*Co) matmul, then one fused y*a + b and ReLU.
        """
        stats = jnp.concatenate([jnp.sum(y, axis=0, keepdims=True),
                                 jnp.sum(y * y, axis=0, keepdims=True)], axis=0)
        folded = jnp.dot(stats, foldm_ref[...],
                         preferred_element_type=jnp.float32)       # (2, Co): [mean; E[x^2]]
        mean = folded[0:1, :]
        # Single-pass var = E[x^2] - mean^2 in f32: fine for activation stats
        # at this scale; use a shifted/two-pass form when gridded (see TODO).
        var = folded[1:2, :] - mean * mean
        a = g_ref[...] * jax.lax.rsqrt(var + EPS)                  # (1, Co)
        b = be_ref[...] - mean * a
        ab = jnp.dot(jnp.concatenate([a, b], axis=0), unfold_ref[...],
                     preferred_element_type=jnp.float32)           # (2, W*Co)
        return jnp.maximum(y * ab[0:1, :] + ab[1:2, :], 0.0)

    # conv1 -> bn1 -> relu1 (result stays in registers: no staging round trip)
    y1 = bn_relu(conv3x3(x_ref[...], t1_ref), g1_ref, be1_ref)     # (NH, WCo) f32

    # conv2 -> bn2 -> relu2, single unmasked lane-dense store
    y2 = bn_relu(conv3x3(y1.reshape(N, H, WCo), t2_ref), g2_ref, be2_ref)
    o_ref[...] = y2.astype(o_ref.dtype)


def _toeplitz_weights(w_hwio, W, dtype):
    """(3, 3, Ci, Co) HWIO kernel -> (3*W*Ci, W*Co) K-stacked width-Toeplitz.

    Block dy (rows [dy*W*Ci, (dy+1)*W*Ci)) satisfies
      T[dy][wi*Ci + ci, wo*Co + co] = w[dy, wi - wo + 1, ci, co] if |wi-wo| <= 1
                                      else 0
    so that, with the three vertically shifted activation rows stacked along K
    in dy order,  taps @ T  implements the 3x3 'SAME' conv in one contraction:
    horizontal taps and horizontal zero padding are fully absorbed by the
    (static) weights; the vertical halo is handled in registers by the kernel.
    """
    kh, kw, Ci, Co = w_hwio.shape
    base = jnp.pad(w_hwio, ((0, 0), (0, W + 2 - kw), (0, 0), (0, 0)))  # (3, W+2, Ci, Co)
    rolled = jnp.stack([jnp.roll(base, wo, axis=1) for wo in range(W)], axis=1)
    t = rolled[:, :, 1:W + 1]                      # (dy, wo, wi, Ci, Co)
    t = t.transpose(0, 2, 3, 1, 4).reshape(kh * W * Ci, W * Co)
    return t.astype(dtype)


def dualconv(x_nhwc, w1_hwio, b1, g1, be1, w2_hwio, b2, g2, be2,
             compute_dtype=jnp.bfloat16):
    """x_nhwc: (N, H, W, Cin); w*_hwio: (3, 3, Ci, Co); b/g/be: (Co,).

    b1/b2 are accepted for API parity with nn.Conv2d but intentionally unused:
    a per-channel constant shift ahead of training-mode BatchNorm is removed
    exactly by the batch mean (variance unchanged).
    """
    del b1, b2
    N, H, W, Cin = x_nhwc.shape
    Cout = w1_hwio.shape[-1]
    M = N * H * W

    # Lane-dense packing: activations carried as (N, H, W*C).  This is a free
    # metadata reshape — NO pad and NO dtype cast in the wrapper, so no extra
    # HBM round trip before the kernel.
    x3 = x_nhwc.reshape(N, H, W * Cin)

    t1 = _toeplitz_weights(w1_hwio, W, compute_dtype)   # (3*W*Cin,  W*Cout)
    t2 = _toeplitz_weights(w2_hwio, W, compute_dtype)   # (3*W*Cout, W*Cout)

    eye = jnp.eye(Cout, dtype=jnp.float32)
    fold_m = jnp.tile(eye, (W, 1)) / float(M)   # (W*Cout, Cout): lane sums -> channel means
    unfold = jnp.tile(eye, (1, W))              # (Cout, W*Cout): channel -> lane broadcast

    g1r = g1.reshape(1, Cout).astype(jnp.float32)
    be1r = be1.reshape(1, Cout).astype(jnp.float32)
    g2r = g2.reshape(1, Cout).astype(jnp.float32)
    be2r = be2.reshape(1, Cout).astype(jnp.float32)

    vmem = pl.BlockSpec(memory_space=pltpu.MemorySpace.VMEM)
    out2d = pl.pallas_call(
        _dualconv_kernel,
        out_shape=jax.ShapeDtypeStruct((N * H, W * Cout), x_nhwc.dtype),
        in_specs=[vmem] * 9,
        out_specs=vmem,
        # Keep the scoped-VMEM raise (v5e default is only 16 MiB); everything
        # here is tiny, so this is headroom, not a requirement.
        compiler_params=pltpu.CompilerParams(vmem_limit_bytes=32 * 1024 * 1024),
    )(x3, t1, g1r, be1r, t2, g2r, be2r, fold_m, unfold)
    return out2d.reshape(N, H, W, Cout)


def ref_forward(x, w1, b1, g1, be1, w2, b2, g2, be2):
    """Plain-JAX reference (NHWC / HWIO), PyTorch training-mode forward."""
    def block(x, w, b, g, be):
        y = jax.lax.conv_general_dilated(
            x, w, (1, 1), 'SAME',
            dimension_numbers=('NHWC', 'HWIO', 'NHWC')) + b
        mean = y.mean(axis=(0, 1, 2), keepdims=True)
        var = ((y - mean) ** 2).mean(axis=(0, 1, 2), keepdims=True)
        y = (y - mean) / jnp.sqrt(var + EPS) * g + be
        return jnp.maximum(y, 0.0)
    return block(block(x, w1, b1, g1, be1), w2, b2, g2, be2)


if __name__ == "__main__":
    # Cout chosen so the lane-dense activation width is W*Cout = 256
    # (feedback: 256-wide matmul output for v6e/v7x; still unmasked stores).
    N, Cin, Cout, H, W = 2, 4, 16, 16, 16

    key = jax.random.PRNGKey(0)
    kx, kw1, kb1, kw2, kb2, kg1, kbe1, kg2, kbe2 = jax.random.split(key, 9)

    # Deterministic synthetic parameters (PyTorch layouts), then convert.
    x_nchw = jax.random.normal(kx, (N, Cin, H, W), jnp.float32)
    w1_oihw = jax.random.normal(kw1, (Cout, Cin, 3, 3), jnp.float32) * 0.1
    b1 = jax.random.normal(kb1, (Cout,), jnp.float32) * 0.1
    w2_oihw = jax.random.normal(kw2, (Cout, Cout, 3, 3), jnp.float32) * 0.1
    b2 = jax.random.normal(kb2, (Cout,), jnp.float32) * 0.1
    g1 = 1.0 + 0.1 * jax.random.normal(kg1, (Cout,), jnp.float32)
    be1 = 0.1 * jax.random.normal(kbe1, (Cout,), jnp.float32)
    g2 = 1.0 + 0.1 * jax.random.normal(kg2, (Cout,), jnp.float32)
    be2 = 0.1 * jax.random.normal(kbe2, (Cout,), jnp.float32)

    # NCHW -> NHWC, OIHW -> HWIO
    x = jnp.transpose(x_nchw, (0, 2, 3, 1))
    w1 = jnp.transpose(w1_oihw, (2, 3, 1, 0))
    w2 = jnp.transpose(w2_oihw, (2, 3, 1, 0))

    out = jax.block_until_ready(dualconv(x, w1, b1, g1, be1, w2, b2, g2, be2))
    ref = ref_forward(x, w1, b1, g1, be1, w2, b2, g2, be2)

    assert out.shape == (N, H, W, Cout)
    # bf16 MXU operands (f32 accumulation / f32 BN) -> bf16-level tolerance.
    err = float(jnp.max(jnp.abs(out - ref)))
    assert jnp.allclose(out, ref, atol=2.5e-2, rtol=2.5e-2), (
        f"mismatch vs JAX reference: max abs err {err:.3e}")

    print("KERNEL_OK")
</pallas_src>

<mosaic_0001>
module attributes {stable_mosaic.version = 11 : i64} {
  func.func @_dualconv_kernel(%arg0: memref<2x16x64xf32, #tpu.memory_space<vmem>>, %arg1: memref<192x256xbf16, #tpu.memory_space<vmem>>, %arg2: memref<1x16xf32, #tpu.memory_space<vmem>>, %arg3: memref<1x16xf32, #tpu.memory_space<vmem>>, %arg4: memref<768x256xbf16, #tpu.memory_space<vmem>>, %arg5: memref<1x16xf32, #tpu.memory_space<vmem>>, %arg6: memref<1x16xf32, #tpu.memory_space<vmem>>, %arg7: memref<256x16xf32, #tpu.memory_space<vmem>>, %arg8: memref<16x256xf32, #tpu.memory_space<vmem>>, %arg9: memref<32x256xf32, #tpu.memory_space<vmem>>) attributes {dimension_semantics = [], scalar_prefetch = 0 : i64, scratch_operands = 0 : i64, tpu.core_type = #tpu.core_type<tc>} {
    %c0 = arith.constant 0 : index
    %c0_0 = arith.constant 0 : index
    %c0_1 = arith.constant 0 : index
    %0 = vector.load %arg0[%c0, %c0_0, %c0_1] : memref<2x16x64xf32, #tpu.memory_space<vmem>>, vector<2x16x64xf32>
    %cst = arith.constant 0.000000e+00 : f32
    %1 = vector.broadcast %cst : f32 to vector<2x1x64xf32>
    %2 = vector.extract_strided_slice %0 {offsets = [0, 0, 0], sizes = [2, 15, 64], strides = [1, 1, 1]} : vector<2x16x64xf32> to vector<2x15x64xf32>
    %3 = tpu.concatenate %1, %2 in 1 : vector<2x1x64xf32>, vector<2x15x64xf32> -> vector<2x16x64xf32>
    %4 = vector.extract_strided_slice %0 {offsets = [0, 1, 0], sizes = [2, 15, 64], strides = [1, 1, 1]} : vector<2x16x64xf32> to vector<2x15x64xf32>
    %5 = tpu.concatenate %4, %1 in 1 : vector<2x15x64xf32>, vector<2x1x64xf32> -> vector<2x16x64xf32>
    %6 = tpu.concatenate %3, %0, %5 in 2 : vector<2x16x64xf32>, vector<2x16x64xf32>, vector<2x16x64xf32> -> vector<2x16x192xf32>
    %7 = vector.shape_cast %6 : vector<2x16x192xf32> to vector<32x192xf32>
    %8 = arith.truncf %7 : vector<32x192xf32> to vector<32x192xbf16>
    %c0_2 = arith.constant 0 : index
    %c0_3 = arith.constant 0 : index
    %9 = vector.load %arg1[%c0_2, %c0_3] : memref<192x256xbf16, #tpu.memory_space<vmem>>, vector<192x256xbf16>
    %cst_4 = arith.constant dense<0.000000e+00> : vector<32x256xf32>
    %10 = tpu.matmul %8, %9, %cst_4 {dimension_numbers = #tpu.dot_dimension_numbers<[1], [0], [0], [1], [0, 0, 1, 1], [], []>} : vector<32x192xbf16>, vector<192x256xbf16>, vector<32x256xf32> -> vector<32x256xf32>
    %cst_5 = arith.constant dense<0.000000e+00> : vector<256xf32>
    %11 = vector.multi_reduction <add>, %10, %cst_5 [0] : vector<32x256xf32> to vector<256xf32>
    %12 = vector.shape_cast %11 : vector<256xf32> to vector<1x256xf32>
    %13 = arith.mulf %10, %10 : vector<32x256xf32>
    %cst_6 = arith.constant dense<0.000000e+00> : vector<256xf32>
    %14 = vector.multi_reduction <add>, %13, %cst_6 [0] : vector<32x256xf32> to vector<256xf32>
    %15 = vector.shape_cast %14 : vector<256xf32> to vector<1x256xf32>
    %16 = tpu.concatenate %12, %15 in 0 : vector<1x256xf32>, vector<1x256xf32> -> vector<2x256xf32>
    %c0_7 = arith.constant 0 : index
    %c0_8 = arith.constant 0 : index
    %17 = vector.load %arg7[%c0_7, %c0_8] : memref<256x16xf32, #tpu.memory_space<vmem>>, vector<256x16xf32>
    %cst_9 = arith.constant dense<0.000000e+00> : vector<2x16xf32>
    %18 = tpu.matmul %16, %17, %cst_9 {dimension_numbers = #tpu.dot_dimension_numbers<[1], [0], [0], [1], [0, 0, 1, 1], [], []>} : vector<2x256xf32>, vector<256x16xf32>, vector<2x16xf32> -> vector<2x16xf32>
    %19 = vector.extract_strided_slice %18 {offsets = [0, 0], sizes = [1, 16], strides = [1, 1]} : vector<2x16xf32> to vector<1x16xf32>
    %20 = vector.extract_strided_slice %18 {offsets = [1, 0], sizes = [1, 16], strides = [1, 1]} : vector<2x16xf32> to vector<1x16xf32>
    %21 = arith.mulf %19, %19 : vector<1x16xf32>
    %22 = arith.subf %20, %21 : vector<1x16xf32>
    %c0_10 = arith.constant 0 : index
    %c0_11 = arith.constant 0 : index
    %23 = vector.load %arg2[%c0_10, %c0_11] : memref<1x16xf32, #tpu.memory_space<vmem>>, vector<1x16xf32>
    %cst_12 = arith.constant 9.99999974E-6 : f32
    %24 = vector.broadcast %cst_12 : f32 to vector<1x16xf32>
    %25 = arith.addf %22, %24 : vector<1x16xf32>
    %26 = math.rsqrt %25 : vector<1x16xf32>
    %27 = arith.mulf %23, %26 : vector<1x16xf32>
    %c0_13 = arith.constant 0 : index
    %c0_14 = arith.constant 0 : index
    %28 = vector.load %arg3[%c0_13, %c0_14] : memref<1x16xf32, #tpu.memory_space<vmem>>, vector<1x16xf32>
    %29 = arith.mulf %19, %27 : vector<1x16xf32>
    %30 = arith.subf %28, %29 : vector<1x16xf32>
    %31 = tpu.concatenate %27, %30 in 0 : vector<1x16xf32>, vector<1x16xf32> -> vector<2x16xf32>
    %c0_15 = arith.constant 0 : index
    %c0_16 = arith.constant 0 : index
    %32 = vector.load %arg8[%c0_15, %c0_16] : memref<16x256xf32, #tpu.memory_space<vmem>>, vector<16x256xf32>
    %cst_17 = arith.constant dense<0.000000e+00> : vector<2x256xf32>
    %33 = tpu.matmul %31, %32, %cst_17 {dimension_numbers = #tpu.dot_dimension_numbers<[1], [0], [0], [1], [0, 0, 1, 1], [], []>} : vector<2x16xf32>, vector<16x256xf32>, vector<2x256xf32> -> vector<2x256xf32>
    %34 = vector.extract_strided_slice %33 {offsets = [0, 0], sizes = [1, 256], strides = [1, 1]} : vector<2x256xf32> to vector<1x256xf32>
    %35 = vector.broadcast %34 : vector<1x256xf32> to vector<32x256xf32>
    %36 = arith.mulf %10, %35 : vector<32x256xf32>
    %37 = vector.extract_strided_slice %33 {offsets = [1, 0], sizes = [1, 256], strides = [1, 1]} : vector<2x256xf32> to vector<1x256xf32>
    %38 = vector.broadcast %37 : vector<1x256xf32> to vector<32x256xf32>
    %39 = arith.addf %36, %38 : vector<32x256xf32>
    %cst_18 = arith.constant 0.000000e+00 : f32
    %40 = vector.broadcast %cst_18 : f32 to vector<32x256xf32>
    %41 = arith.maximumf %39, %40 : vector<32x256xf32>
    %42 = vector.shape_cast %41 : vector<32x256xf32> to vector<2x16x256xf32>
    %cst_19 = arith.constant 0.000000e+00 : f32
    %43 = vector.broadcast %cst_19 : f32 to vector<2x1x256xf32>
    %44 = vector.extract_strided_slice %42 {offsets = [0, 0, 0], sizes = [2, 15, 256], strides = [1, 1, 1]} : vector<2x16x256xf32> to vector<2x15x256xf32>
    %45 = tpu.concatenate %43, %44 in 1 : vector<2x1x256xf32>, vector<2x15x256xf32> -> vector<2x16x256xf32>
    %46 = vector.extract_strided_slice %42 {offsets = [0, 1, 0], sizes = [2, 15, 256], strides = [1, 1, 1]} : vector<2x16x256xf32> to vector<2x15x256xf32>
    %47 = tpu.concatenate %46, %43 in 1 : vector<2x15x256xf32>, vector<2x1x256xf32> -> vector<2x16x256xf32>
    %48 = tpu.concatenate %45, %42, %47 in 2 : vector<2x16x256xf32>, vector<2x16x256xf32>, vector<2x16x256xf32> -> vector<2x16x768xf32>
    %49 = vector.shape_cast %48 : vector<2x16x768xf32> to vector<32x768xf32>
    %50 = arith.truncf %49 : vector<32x768xf32> to vector<32x768xbf16>
    %c0_20 = arith.constant 0 : index
    %c0_21 = arith.constant 0 : index
    %51 = vector.load %arg4[%c0_20, %c0_21] : memref<768x256xbf16, #tpu.memory_space<vmem>>, vector<768x256xbf16>
    %cst_22 = arith.constant dense<0.000000e+00> : vector<32x256xf32>
    %52 = tpu.matmul %50, %51, %cst_22 {dimension_numbers = #tpu.dot_dimension_numbers<[1], [0], [0], [1], [0, 0, 1, 1], [], []>} : vector<32x768xbf16>, vector<768x256xbf16>, vector<32x256xf32> -> vector<32x256xf32>
    %cst_23 = arith.constant dense<0.000000e+00> : vector<256xf32>
    %53 = vector.multi_reduction <add>, %52, %cst_23 [0] : vector<32x256xf32> to vector<256xf32>
    %54 = vector.shape_cast %53 : vector<256xf32> to vector<1x256xf32>
    %55 = arith.mulf %52, %52 : vector<32x256xf32>
    %cst_24 = arith.constant dense<0.000000e+00> : vector<256xf32>
    %56 = vector.multi_reduction <add>, %55, %cst_24 [0] : vector<32x256xf32> to vector<256xf32>
    %57 = vector.shape_cast %56 : vector<256xf32> to vector<1x256xf32>
    %58 = tpu.concatenate %54, %57 in 0 : vector<1x256xf32>, vector<1x256xf32> -> vector<2x256xf32>
    %c0_25 = arith.constant 0 : index
    %c0_26 = arith.constant 0 : index
    %59 = vector.load %arg7[%c0_25, %c0_26] : memref<256x16xf32, #tpu.memory_space<vmem>>, vector<256x16xf32>
    %cst_27 = arith.constant dense<0.000000e+00> : vector<2x16xf32>
    %60 = tpu.matmul %58, %59, %cst_27 {dimension_numbers = #tpu.dot_dimension_numbers<[1], [0], [0], [1], [0, 0, 1, 1], [], []>} : vector<2x256xf32>, vector<256x16xf32>, vector<2x16xf32> -> vector<2x16xf32>
    %61 = vector.extract_strided_slice %60 {offsets = [0, 0], sizes = [1, 16], strides = [1, 1]} : vector<2x16xf32> to vector<1x16xf32>
    %62 = vector.extract_strided_slice %60 {offsets = [1, 0], sizes = [1, 16], strides = [1, 1]} : vector<2x16xf32> to vector<1x16xf32>
    %63 = arith.mulf %61, %61 : vector<1x16xf32>
    %64 = arith.subf %62, %63 : vector<1x16xf32>
    %c0_28 = arith.constant 0 : index
    %c0_29 = arith.constant 0 : index
    %65 = vector.load %arg5[%c0_28, %c0_29] : memref<1x16xf32, #tpu.memory_space<vmem>>, vector<1x16xf32>
    %cst_30 = arith.constant 9.99999974E-6 : f32
    %66 = vector.broadcast %cst_30 : f32 to vector<1x16xf32>
    %67 = arith.addf %64, %66 : vector<1x16xf32>
    %68 = math.rsqrt %67 : vector<1x16xf32>
    %69 = arith.mulf %65, %68 : vector<1x16xf32>
    %c0_31 = arith.constant 0 : index
    %c0_32 = arith.constant 0 : index
    %70 = vector.load %arg6[%c0_31, %c0_32] : memref<1x16xf32, #tpu.memory_space<vmem>>, vector<1x16xf32>
    %71 = arith.mulf %61, %69 : vector<1x16xf32>
    %72 = arith.subf %70, %71 : vector<1x16xf32>
    %73 = tpu.concatenate %69, %72 in 0 : vector<1x16xf32>, vector<1x16xf32> -> vector<2x16xf32>
    %c0_33 = arith.constant 0 : index
    %c0_34 = arith.constant 0 : index
    %74 = vector.load %arg8[%c0_33, %c0_34] : memref<16x256xf32, #tpu.memory_space<vmem>>, vector<16x256xf32>
    %cst_35 = arith.constant dense<0.000000e+00> : vector<2x256xf32>
    %75 = tpu.matmul %73, %74, %cst_35 {dimension_numbers = #tpu.dot_dimension_numbers<[1], [0], [0], [1], [0, 0, 1, 1], [], []>} : vector<2x16xf32>, vector<16x256xf32>, vector<2x256xf32> -> vector<2x256xf32>
    %76 = vector.extract_strided_slice %75 {offsets = [0, 0], sizes = [1, 256], strides = [1, 1]} : vector<2x256xf32> to vector<1x256xf32>
    %77 = vector.broadcast %76 : vector<1x256xf32> to vector<32x256xf32>
    %78 = arith.mulf %52, %77 : vector<32x256xf32>
    %79 = vector.extract_strided_slice %75 {offsets = [1, 0], sizes = [1, 256], strides = [1, 1]} : vector<2x256xf32> to vector<1x256xf32>
    %80 = vector.broadcast %79 : vector<1x256xf32> to vector<32x256xf32>
    %81 = arith.addf %78, %80 : vector<32x256xf32>
    %cst_36 = arith.constant 0.000000e+00 : f32
    %82 = vector.broadcast %cst_36 : f32 to vector<32x256xf32>
    %83 = arith.maximumf %81, %82 : vector<32x256xf32>
    %c0_37 = arith.constant 0 : index
    %c0_38 = arith.constant 0 : index
    %84 = vector.load %arg9[%c0_37, %c0_38] : memref<32x256xf32, #tpu.memory_space<vmem>>, vector<32x256xf32>
    tpu.vector_store %arg9[%c0_37, %c0_38], %83 {strides = array<i32>} : memref<32x256xf32, #tpu.memory_space<vmem>>, vector<32x256xf32>,
    return
  }
}

</mosaic_0001>

<bundles_post_ra>
// kernel: tpu_custom_call.1
= control target key start
LH: loop header
LB: loop body
LE: loop exit
PB: predicated region body
PF: predicated region fallthrough
CT: control target
= control target key end

     0   :  { %14 = vsyncpa [#allocation3], 0  ;;  %s2864_s0 = inlined_call_operand.vmem [shape: f32[2,16,64], index: 0, kind: input, shape index: {}]   ;;  %s2865_s1 = inlined_call_operand.vmem [shape: bf16[192,256], index: 1, kind: input, shape index: {}]   ;;  %s2866_s2 = inlined_call_operand.vmem [shape: f32[1,16], index: 2, kind: input, shape index: {}]   ;;  %s2867_s3 = inlined_call_operand.vmem [shape: f32[1,16], index: 3, kind: input, shape index: {}]   ;;  %s2868_s4 = inlined_call_operand.hbm [shape: bf16[768,256], index: 4, kind: input, shape index: {}]   ;;  %s2869_s5 = inlined_call_operand.vmem [shape: f32[1,16], index: 5, kind: input, shape index: {}]   ;;  %s2870_s6 = inlined_call_operand.vmem [shape: f32[1,16], index: 6, kind: input, shape index: {}]   ;;  %s2871_s7 = inlined_call_operand.vmem [shape: f32[256,16], index: 7, kind: input, shape index: {}]   ;;  %s2872_s8 = inlined_call_operand.vmem [shape: f32[16,256], index: 8, kind: input, shape index: {}]   ;;  %s2873_s9 = inlined_call_operand.hbm [shape: f32[32,256], index: 9, kind: output, shape index: {}]  }
   0x1   :  { %15 = vsyncpa [#allocation4], 0  ;;  %s2265_s30 = smov [#allocation2]   ;;  %s2217_s13 = scalar_lea.hbm %s2868_s4, 12288 }
   0x2   :  { %s29_s10 = sshll.u32 %s2265_s30, 4  ;;  %p2218_p0 = scmp.ne.s32.totalorder %s2868_s4, %s2217_s13  ;;  %s30_s10 = int_to_ptr.vmem [resolvable:$true] %s29_s10 }
   0x3   :  { %p2221_p1 = scmp.lt.u32.totalorder %s2217_s13, %s2868_s4 }
   0x5   :  { %p2223_p2 = pnand %p2221_p1, %p2218_p0 }
   0x7   :  { %2226 = shalt.err (!%p2223_p2)
}
   0x8   :  { %s2227_s18 = scalar_lea.vmem %s30_s10, 12288  ;;  %p2232_p4 = scmp.lt.s32.totalorder %s30_s10, %s30_s10 }
   0x9   :  { %p2228_p3 = scmp.ne.s32.totalorder %s30_s10, %s2227_s18  ;;  %p2233_p5 = scmp.lt.s32.totalorder %s2227_s18, %s2227_s18 }
   0xb   :  { %p2234_p6 = por %p2233_p5, %p2232_p4 }
   0xd   :  { %p2235_p7 = pnand %p2234_p6, %p2228_p3 }
   0xf   :  { %2238 = shalt.err (!%p2235_p7)
}
  0x10   :  { %s2266_s19 = smov 128   ;;  %s2267_s20 = smov 8  }
  0x11   :  { %35 = dma.hbm_to_vmem [thread:$0]  %s2868_s4, 12288, %s30_s10, [#allocation3], %s2266_s19, %s2266_s19, %s2267_s20  }
  0x12   :  { %2261 = dma.done.wait [#allocation3], 12288  }
  0x13   :  { %2262 = vsyncadd [#allocation3], 4294955008  ;;  %v2340_v0 = vld [vmem:[%s2864_s0] sm:$0xff]  ;;  %v49_v1 = vld [vmem:[%s2864_s0 + $0x8] sm:$0xff]  ;;  %vm69_vm0 = vcmask 1046528   ;;  %vm56_vm1 = vcmask 1040384  }
  0x14   :  { %v2348_v2 = vld [vmem:[%s2864_s0 + $0x10] sm:$0xff]  ;;  %v58_v3 = vrot.slane %v49_v1, 7  ;;  %v2023_v4 = vpack.i.bf16 %v49_v1, %v2340_v0  ;;  %v57_v5 = vrot.slane %v2340_v0, 7  ;;  %v70_v6 = vrot.slane %v2340_v0, 1  ;;  %v51_v7 = vld [vmem:[%s2864_s0 + $0x18] sm:$0xff]  ;;  %s2268_s11 = smov 64   ;;  %vm2713_vm4 = vmneg %vm56_vm1 }
  0x15   :  { %v61_v8 = vrot.slane %v51_v7, 7  ;;  %v74_v9 = vrot.slane %v51_v7, 1  ;;  %v60_v10 = vrot.slane %v2348_v2, 7  ;;  %v2033_v11 = vld [vmem:[%s2865_s1 + $0x4] ss:$8 sps:$4 sm:$0xff]   ;;  %v2028_v12 = vpack.i.bf16 %v51_v7, %v2348_v2 }
  0x16   :  { %2024 = vrot.lane.b32.xlu0 %v2023_v4, %s2268_s11  ;;  %v73_v13 = vrot.slane %v2348_v2, 1  ;;  %v2035_v14 = vld [vmem:[%s2865_s1] ss:$8 sps:$4 sm:$0xff]   ;;  %v2036_v15 = vld [vmem:[%s2865_s1 + $0x14] ss:$8 sps:$4 sm:$0xff]   ;;  %v2371_v16 = vsel %vm56_vm1, %v57_v5, %v58_v3  ;;  %253 = vmatprep.subr.bf16.mxu0 %v2033_v11  ;;  %v71_v17 = vrot.slane %v49_v1, 1 }
  0x17   :  { %v2376_v18 = vsel %vm56_vm1, %v60_v10, %v61_v8  ;;  %254 = vmatpush1.bf16.msra.mxu0 %v2035_v14  ;;  %v2038_v19 = vld [vmem:[%s2865_s1 + $0x10] ss:$8 sps:$4 sm:$0xff]   ;;  %v2385_v21 = vsel %vm69_vm0, %v74_v9, 0.0  ;;  %v2039_v22 = vld [vmem:[%s2865_s1 + $0x24] ss:$8 sps:$4 sm:$0xff]   ;;  %vm94_vm2 = vcmask 523264  }
  0x18   :  { %v2382_v20 = vsel %vm69_vm0, %v73_v13, %v74_v9  ;;  %255 = vmatprep.subr.bf16.mxu0 %v2036_v15  ;;  %v72_v23 = vsel %vm69_vm0, %v70_v6, %v71_v17  ;;  %v80_v24 = vsel %vm69_vm0, %v71_v17, 0.0  ;;  %v2041_v27 = vld [vmem:[%s2865_s1 + $0x20] ss:$8 sps:$4 sm:$0xff]   ;;  %v2042_v28 = vld [vmem:[%s2865_s1 + $0x34] ss:$8 sps:$4 sm:$0xff]   ;;  %v67_v53 = vsel %vm56_vm1, 0.0, %v57_v5 }
  0x19   :  { %v102_v25 = vpack.c.bf16 %v2385_v21, %v2382_v20  ;;  %v100_v26 = vpack.c.bf16 %v80_v24, %v72_v23  ;;  %v2044_v29 = vld [vmem:[%s2865_s1 + $0x30] ss:$8 sps:$4 sm:$0xff]   ;;  %v2045_v30 = vld [vmem:[%s2865_s1 + $0x44] ss:$8 sps:$4 sm:$0xff]   ;;  %v2047_v31 = vld [vmem:[%s2865_s1 + $0x40] ss:$8 sps:$4 sm:$0xff]  }
  0x1a   :  { %2029 = vrot.lane.b32.xlu0 %v2028_v12, %s2268_s11  ;;  %v2048_v32 = vld [vmem:[%s2865_s1 + $0x54] ss:$8 sps:$4 sm:$0xff]   ;;  %v368_v33 = vld [vmem:[%s2871_s7 + $0x80] sm:$0xff]  ;;  %v369_v34 = vld [vmem:[%s2871_s7 + $0x88] sm:$0xff]  ;;  %v68_v60 = vsel %vm56_vm1, 0.0, %v60_v10  ;;  %vm494_vm3 = vcmask 130048  }
  0x1b   :  { %256 = vmatpush1.bf16.msra.mxu0 %v2038_v19  ;;  %1727 = vmatprep.mubr.msk.bf16.mxu0 %vm94_vm2, %v100_v26  ;;  %v352_v35 = vld [vmem:[%s2871_s7] sm:$0xff]  ;;  %v353_v36 = vld [vmem:[%s2871_s7 + $0x8] sm:$0xff]  ;;  %v2050_v37 = vld [vmem:[%s2865_s1 + $0x50] ss:$8 sps:$4 sm:$0xff]   ;;  %v2428_v38 = vpack.c.bf16 %v369_v34, %v368_v33  ;;  %vm2271_vm5 = vmmov 1  }
  0x1c   :  { %257 = vmatprep.subr.bf16.mxu0 %v2039_v22  ;;  %v2430_v39 = vpack.c.bf16 %v353_v36, %v352_v35  ;;  %v2051_v40 = vld [vmem:[%s2865_s1 + $0x64] ss:$8 sps:$4 sm:$0xff]   ;;  %v2053_v41 = vld [vmem:[%s2865_s1 + $0x60] ss:$8 sps:$4 sm:$0xff]   ;;  %v2054_v42 = vld [vmem:[%s2865_s1 + $0x74] ss:$8 sps:$4 sm:$0xff]  }
  0x1d   :  { %1926 = vmatprep.subr.bf16.mxu1 %v2428_v38  ;;  %v2056_v43 = vld [vmem:[%s2865_s1 + $0x70] ss:$8 sps:$4 sm:$0xff]   ;;  %v2057_v44 = vld [vmem:[%s2865_s1 + $0x84] ss:$8 sps:$4 sm:$0xff]   ;;  %v2059_v45 = vld [vmem:[%s2865_s1 + $0x80] ss:$8 sps:$4 sm:$0xff]  }
  0x1e   :  { %1928 = vmatpush3.bf16.msra.mxu1 %v2430_v39  ;;  %v2060_v46 = vld [vmem:[%s2865_s1 + $0x94] ss:$8 sps:$4 sm:$0xff]   ;;  %v2062_v47 = vld [vmem:[%s2865_s1 + $0x90] ss:$8 sps:$4 sm:$0xff]   ;;  %v2063_v48 = vld [vmem:[%s2865_s1 + $0xa4] ss:$8 sps:$4 sm:$0xff]  }
  0x1f   :  { %258 = vmatpush1.bf16.msra.mxu0 %v2041_v27  ;;  %v2065_v49 = vld [vmem:[%s2865_s1 + $0xa0] ss:$8 sps:$4 sm:$0xff]   ;;  %v2066_v50 = vld [vmem:[%s2865_s1 + $0xb4] ss:$8 sps:$4 sm:$0xff]   ;;  %v2068_v51 = vld [vmem:[%s2865_s1 + $0xb0] ss:$8 sps:$4 sm:$0xff]  }
  0x20   :  { %259 = vmatprep.subr.bf16.mxu0 %v2042_v28  ;;  %v370_v2 = vld [vmem:[%s2871_s7 + $0x90] sm:$0xff]  ;;  %v371_v3 = vld [vmem:[%s2871_s7 + $0x98] sm:$0xff]  ;;  %v372_v8 = vld [vmem:[%s2871_s7 + $0xa0] sm:$0xff] }
  0x21   :  { %v2492_v4 = vpack.c.bf16 %v371_v3, %v370_v2  ;;  %v354_v5 = vld [vmem:[%s2871_s7 + $0x10] sm:$0xff]  ;;  %v355_v6 = vld [vmem:[%s2871_s7 + $0x18] sm:$0xff]  ;;  %v373_v9 = vld [vmem:[%s2871_s7 + $0xa8] sm:$0xff] }
  0x22   :  { %v2500_v7 = vpack.c.bf16 %v355_v6, %v354_v5  ;;  %v2510_v10 = vpack.c.bf16 %v373_v9, %v372_v8  ;;  %v356_v11 = vld [vmem:[%s2871_s7 + $0x20] sm:$0xff]  ;;  %v357_v12 = vld [vmem:[%s2871_s7 + $0x28] sm:$0xff]  ;;  %v374_v14 = vld [vmem:[%s2871_s7 + $0xb0] sm:$0xff] }
  0x23   :  { %260 = vmatpush1.bf16.msra.mxu0 %v2044_v29  ;;  %1930 = vmatprep.subr.bf16.mxu1 %v2492_v4  ;;  %v2518_v13 = vpack.c.bf16 %v357_v12, %v356_v11  ;;  %v375_v15 = vld [vmem:[%s2871_s7 + $0xb8] sm:$0xff]  ;;  %v358_v17 = vld [vmem:[%s2871_s7 + $0x30] sm:$0xff]  ;;  %v376_v20 = vld [vmem:[%s2871_s7 + $0xc0] sm:$0xff] }
  0x24   :  { %261 = vmatprep.subr.bf16.mxu0 %v2045_v30  ;;  %1932 = vmatpush3.bf16.msra.mxu1 %v2500_v7  ;;  %v377_v21 = vld [vmem:[%s2871_s7 + $0xc8] sm:$0xff]  ;;  %v360_v23 = vld [vmem:[%s2871_s7 + $0x40] sm:$0xff]  ;;  %v378_v26 = vld [vmem:[%s2871_s7 + $0xd0] sm:$0xff] }
  0x25   :  { %1934 = vmatprep.subr.bf16.mxu1 %v2510_v10  ;;  %v2546_v22 = vpack.c.bf16 %v377_v21, %v376_v20  ;;  %v361_v24 = vld [vmem:[%s2871_s7 + $0x48] sm:$0xff]  ;;  %v379_v27 = vld [vmem:[%s2871_s7 + $0xd8] sm:$0xff]  ;;  %v362_v29 = vld [vmem:[%s2871_s7 + $0x50] sm:$0xff] }
  0x26   :  { %v2564_v28 = vpack.c.bf16 %v379_v27, %v378_v26  ;;  %v363_v30 = vld [vmem:[%s2871_s7 + $0x58] sm:$0xff]  ;;  %v381_v33 = vld [vmem:[%s2871_s7 + $0xe8] sm:$0xff]  ;;  %v364_v34 = vld [vmem:[%s2871_s7 + $0x60] sm:$0xff] }
  0x27   :  { %262 = vmatpush1.bf16.msra.mxu0 %v2047_v31  ;;  %v2572_v31 = vpack.c.bf16 %v363_v30, %v362_v29  ;;  %v365_v36 = vld [vmem:[%s2871_s7 + $0x68] sm:$0xff]  ;;  %vm2724_vm6 = vmpackc.low %vm2271_vm5, %vm2713_vm4 }
  0x28   :  { %263 = vmatprep.subr.bf16.mxu0 %v2048_v32  ;;  %1936 = vmatpush3.bf16.msra.mxu1 %v2518_v13  ;;  %v380_v32 = vld [vmem:[%s2871_s7 + $0xe0] sm:$0xff]  ;;  %vm2752_vm7 = vmpackc.low %vm69_vm0, %vm2271_vm5 }
  0x29   :  { %v2585_v35 = vpack.c.bf16 %v381_v33, %v380_v32 }
  0x2b   :  { %264 = vmatpush1.bf16.msra.mxu0 %v2050_v37  ;;  %v382_v37 = vld [vmem:[%s2871_s7 + $0xf0] sm:$0xff] }
  0x2c   :  { %265 = vmatprep.subr.bf16.mxu0 %v2051_v40  ;;  %v383_v40 = vld [vmem:[%s2871_s7 + $0xf8] sm:$0xff] }
  0x2f   :  { %266 = vmatpush1.bf16.msra.mxu0 %v2053_v41  ;;  %v2596_v41 = vpack.c.bf16 %v365_v36, %v364_v34 }
  0x30   :  { %267 = vmatprep.subr.bf16.mxu0 %v2054_v42  ;;  %v2598_v42 = vpack.c.bf16 %v383_v40, %v382_v37 }
  0x33   :  { %268 = vmatpush1.bf16.msra.mxu0 %v2056_v43  ;;  %v366_v43 = vld [vmem:[%s2871_s7 + $0x70] sm:$0xff] }
  0x34   :  { %269 = vmatprep.subr.bf16.mxu0 %v2057_v44  ;;  %v367_v44 = vld [vmem:[%s2871_s7 + $0x78] sm:$0xff] }
  0x37   :  { %270 = vmatpush1.bf16.msra.mxu0 %v2059_v45  ;;  %v2608_v45 = vpack.c.bf16 %v367_v44, %v366_v43 }
  0x38   :  { %271 = vmatprep.subr.bf16.mxu0 %v2060_v46 }
  0x3b   :  { %272 = vmatpush1.bf16.msra.mxu0 %v2062_v47 }
  0x3c   :  { %273 = vmatprep.subr.bf16.mxu0 %v2063_v48 }
  0x3f   :  { %274 = vmatpush1.bf16.msra.mxu0 %v2065_v49 }
  0x40   :  { %275 = vmatprep.subr.bf16.mxu0 %v2066_v50 }
  0x43   :  { %276 = vmatpush1.bf16.msra.mxu0 %v2068_v51 }
  0x88   :  { %v2025_v52 = vpop.permute.xlu0 %2024 }
  0x89   :  { %v2027_v54 = vunpack.i.h.bf16 %v2025_v52  ;;  %v2026_v55 = vunpack.i.l.bf16 %v2025_v52 }
  0x8b   :  { %v95_v56 = vsel %vm94_vm2, %v67_v53, %v2026_v55  ;;  %v96_v57 = vsel %vm94_vm2, %v2371_v16, %v2027_v54  ;;  %v2528_v16 = vpack.c.bf16 %v375_v15, %v374_v14 }
  0x8c   :  { %v99_v58 = vpack.c.bf16 %v96_v57, %v95_v56  ;;  %v2030_v59 = vpop.permute.xlu0 %2029 }
  0x8d   :  { %v2032_v61 = vunpack.i.h.bf16 %v2030_v59  ;;  %v2031_v62 = vunpack.i.l.bf16 %v2030_v59  ;;  %1938 = vmatprep.subr.bf16.mxu1 %v2528_v16 }
  0x8e   :  { %286 = vmatmul.mubr.bf16.vlgmr.msra.gmra.mrb[0].mxu0 %v99_v58 }
  0x8f   :  { %1728 = vmatprep.mubr.msk.bf16.mxu0 %vm94_vm2, %v102_v25  ;;  %v97_v63 = vsel %vm94_vm2, %v68_v60, %v2031_v62  ;;  %v98_v0 = vsel %vm94_vm2, %v2376_v18, %v2032_v61  ;;  %v359_v18 = vld [vmem:[%s2871_s7 + $0x38] sm:$0xff]  ;;  %v2554_v25 = vpack.c.bf16 %v361_v24, %v360_v23 }
  0x90   :  { %v101_v1 = vpack.c.bf16 %v98_v0, %v97_v63  ;;  %v2536_v19 = vpack.c.bf16 %v359_v18, %v358_v17 }
  0x92   :  { %1940 = vmatpush3.bf16.msra.mxu1 %v2536_v19 }
  0x93   :  { %1942 = vmatprep.subr.bf16.mxu1 %v2546_v22 }
  0x96   :  { %296 = vmatmul.mubr.bf16.gmra.mrb[4].mxu0 %v101_v1  ;;  %1944 = vmatpush3.bf16.msra.mxu1 %v2554_v25 }
  0x97   :  { %1946 = vmatprep.subr.bf16.mxu1 %v2564_v28 }
  0x9a   :  { %1948 = vmatpush3.bf16.msra.mxu1 %v2572_v31 }
  0x9b   :  { %1950 = vmatprep.subr.bf16.mxu1 %v2585_v35 }
  0x9e   :  { %1952 = vmatpush3.bf16.msra.mxu1 %v2596_v41 }
  0x9f   :  { %1954 = vmatprep.subr.bf16.mxu1 %v2598_v42 }
  0xa2   :  { %1956 = vmatpush3.bf16.msra.mxu1 %v2608_v45 }
 0x161   :  { %v2612_v46 = vpop.f32.mrb[0].mxu0 }
 0x162   :  { %v2614_v47 = vpop.f32.mrb[1].mxu0  ;;  %v324_v49 = vmul.f32 %v2612_v46, %v2612_v46 }
 0x163   :  { %v2616_v48 = vpop.f32.mrb[2].mxu0  ;;  %v325_v53 = vmul.f32 %v2614_v47, %v2614_v47 }
 0x164   :  { %v306_v50 = vadd.f32 %v2616_v48, %v2612_v46  ;;  %v326_v51 = vmul.f32 %v2616_v48, %v2616_v48  ;;  %v2624_v52 = vpop.f32.mrb[3].mxu0 }
 0x165   :  { %v315_v54 = vadd.f32 %v2624_v52, %v2614_v47  ;;  %v327_v55 = vmul.f32 %v2624_v52, %v2624_v52 }
 0x166   :  { %v332_v56 = vadd.f32 %v326_v51, %v324_v49 }
 0x167   :  { %v341_v57 = vadd.f32 %v327_v55, %v325_v53 }
 0x169   :  { %v2632_v58 = vpop.f32.mrb[4].mxu0 }
 0x16a   :  { %v307_v59 = vadd.f32 %v306_v50, %v2632_v58  ;;  %v328_v60 = vmul.f32 %v2632_v58, %v2632_v58  ;;  %v2637_v61 = vpop.f32.mrb[5].mxu0 }
 0x16b   :  { %v316_v62 = vadd.f32 %v315_v54, %v2637_v61  ;;  %v329_v63 = vmul.f32 %v2637_v61, %v2637_v61  ;;  %v2642_v0 = vpop.f32.mrb[6].mxu0 }
 0x16c   :  { %v333_v1 = vadd.f32 %v332_v56, %v328_v60  ;;  %v308_v2 = vadd.f32 %v307_v59, %v2642_v0  ;;  %v330_v3 = vmul.f32 %v2642_v0, %v2642_v0  ;;  %v2647_v5 = vpop.f32.mrb[7].mxu0  ;;  %v491_v56 = vld [vmem:[%s2872_s8 + $0x8] sm:$0xff]  ;;  %v490_v60 = vld [vmem:[%s2872_s8] sm:$0xff] }
 0x16d   :  { %v342_v6 = vadd.f32 %v341_v57, %v329_v63  ;;  %v317_v8 = vadd.f32 %v316_v62, %v2647_v5  ;;  %v331_v9 = vmul.f32 %v2647_v5, %v2647_v5  ;;  %v493_v57 = vld [vmem:[%s2872_s8 + $0x18] sm:$0xff]  ;;  %v492_v62 = vld [vmem:[%s2872_s8 + $0x10] sm:$0xff] }
 0x16e   :  { %v309_v11 = vrot.slane %v308_v2, 4  ;;  %v334_v12 = vadd.f32 %v333_v1, %v330_v3  ;;  %v2660_v59 = vpack.c.bf16 %v493_v57, %v491_v56  ;;  %v2668_v63 = vpack.c.bf16 %v492_v62, %v490_v60  ;;  %v2071_v3 = vld [vmem:[#allocation2 + $0x104] ss:$8 sps:$4 sm:$0xff]  }
 0x16f   :  { %v318_v14 = vrot.slane %v317_v8, 4  ;;  %v343_v15 = vadd.f32 %v342_v6, %v331_v9  ;;  %v2269_v1 = vmov 0.0   ;;  %v2074_v6 = vld [vmem:[#allocation2 + $0x4] ss:$8 sps:$4 sm:$0xff]   ;;  %1306 = vmatprep.subr.bf16.mxu1 %v2071_v3  ;;  %v2075_v9 = vld [vmem:[#allocation2 + $0x110] ss:$8 sps:$4 sm:$0xff]   ;;  %v466_v62 = vlaneseq }
 0x170   :  { %v310_v17 = vadd.f32 %v309_v11, %v308_v2  ;;  %v335_v18 = vrot.slane %v334_v12, 4  ;;  %1958 = vmatprep.subr.bf16.mxu0 %v2660_v59  ;;  %562 = vmatprep.mubr.f32.mxu0 %v2269_v1  ;;  %v2069_v2 = vld [vmem:[#allocation2 + $0x100] ss:$8 sps:$4 sm:$0xff]   ;;  %v2083_v11 = vld [vmem:[#allocation2 + $0x124] ss:$8 sps:$4 sm:$0xff]  }
 0x171   :  { %v319_v20 = vadd.f32 %v318_v14, %v317_v8  ;;  %v344_v21 = vrot.slane %v343_v15, 4  ;;  %1960 = vmatpush1.bf16.msra.mxu0 %v2668_v63  ;;  %v2077_v8 = vld [vmem:[#allocation2 + $0x114] ss:$8 sps:$4 sm:$0xff]   ;;  %v2270_v57 = vmov 1966171168   ;;  %v2673_v3 = vshrl.u32 %v466_v62, 7 }
 0x172   :  { %v311_v23 = vrot.slane %v310_v17, 2  ;;  %v336_v24 = vadd.f32 %v335_v18, %v334_v12  ;;  %1253 = vmatprep.subr.bf16.mxu0 %v2074_v6  ;;  %v2081_v12 = vld [vmem:[#allocation2 + $0x120] ss:$8 sps:$4 sm:$0xff]   ;;  %v2089_v14 = vld [vmem:[#allocation2 + $0x134] ss:$8 sps:$4 sm:$0xff]   ;;  %v464_v60 = vunpack.c.l.s4 %v2270_v57 }
 0x173   :  { %v320_v26 = vrot.slane %v319_v20, 2  ;;  %v345_v27 = vadd.f32 %v344_v21, %v343_v15  ;;  %v2087_v15 = vld [vmem:[#allocation2 + $0x130] ss:$8 sps:$4 sm:$0xff]   ;;  %v2093_v18 = vld [vmem:[#allocation2 + $0x140] ss:$8 sps:$4 sm:$0xff]  }
 0x174   :  { %v312_v29 = vadd.f32 %v311_v23, %v310_v17  ;;  %v337_v30 = vrot.slane %v336_v24, 2  ;;  %v2095_v17 = vld [vmem:[#allocation2 + $0x144] ss:$8 sps:$4 sm:$0xff]   ;;  %v2099_v21 = vld [vmem:[#allocation2 + $0x150] ss:$8 sps:$4 sm:$0xff]  }
 0x175   :  { %v321_v32 = vadd.f32 %v320_v26, %v319_v20  ;;  %v346_v33 = vrot.slane %v345_v27, 2  ;;  %v2101_v20 = vld [vmem:[#allocation2 + $0x154] ss:$8 sps:$4 sm:$0xff]   ;;  %v2107_v23 = vld [vmem:[#allocation2 + $0x164] ss:$8 sps:$4 sm:$0xff]  }
 0x176   :  { %v313_v34 = vrot.slane %v312_v29, 1  ;;  %v338_v36 = vadd.f32 %v337_v30, %v336_v24  ;;  %v2105_v24 = vld [vmem:[#allocation2 + $0x160] ss:$8 sps:$4 sm:$0xff]   ;;  %v2113_v26 = vld [vmem:[#allocation2 + $0x174] ss:$8 sps:$4 sm:$0xff]  }
 0x177   :  { %v322_v37 = vrot.slane %v321_v32, 1  ;;  %v347_v40 = vadd.f32 %v346_v33, %v345_v27  ;;  %v2111_v27 = vld [vmem:[#allocation2 + $0x170] ss:$8 sps:$4 sm:$0xff]   ;;  %v2117_v30 = vld [vmem:[#allocation2 + $0x180] ss:$8 sps:$4 sm:$0xff]  }
 0x178   :  { %v339_v43 = vrot.slane %v338_v36, 1  ;;  %v314_v49 = vadd.f32 %v313_v34, %v312_v29  ;;  %v2119_v29 = vld [vmem:[#allocation2 + $0x184] ss:$8 sps:$4 sm:$0xff]   ;;  %v2123_v33 = vld [vmem:[#allocation2 + $0x190] ss:$8 sps:$4 sm:$0xff]  }
 0x179   :  { %v348_v44 = vrot.slane %v347_v40, 1  ;;  %v323_v51 = vadd.f32 %v322_v37, %v321_v32  ;;  %v2125_v32 = vld [vmem:[#allocation2 + $0x194] ss:$8 sps:$4 sm:$0xff]   ;;  %v2131_v34 = vld [vmem:[#allocation2 + $0x1a4] ss:$8 sps:$4 sm:$0xff]  }
 0x17a   :  { %v340_v50 = vadd.f32 %v339_v43, %v338_v36  ;;  %v2129_v36 = vld [vmem:[#allocation2 + $0x1a0] ss:$8 sps:$4 sm:$0xff]   ;;  %v2137_v37 = vld [vmem:[#allocation2 + $0x1b4] ss:$8 sps:$4 sm:$0xff]   ;;  %v2143_v43 = vld [vmem:[#allocation2 + $0x1c4] ss:$8 sps:$4 sm:$0xff]  }
 0x17b   :  { %v349_v53 = vadd.f32 %v348_v44, %v347_v40  ;;  %v2135_v40 = vld [vmem:[#allocation2 + $0x1b0] ss:$8 sps:$4 sm:$0xff]   ;;  %v2141_v44 = vld [vmem:[#allocation2 + $0x1c0] ss:$8 sps:$4 sm:$0xff]   ;;  %v2134_v57 = vld [vmem:[#allocation2 + $0xa4] ss:$8 sps:$4 sm:$0xff]  }
 0x17c   :  { %v350_v54 = vsel %vm56_vm1, %v314_v49, %v340_v50  ;;  %v2140_v62 = vld [vmem:[#allocation2 + $0xb4] ss:$8 sps:$4 sm:$0xff]  }
 0x17d   :  { %v351_v55 = vsel %vm56_vm1, %v323_v51, %v349_v53 }
 0x17e   :  { %448 = vmatprep.mubr.f32.mxu1 %v351_v55 }
 0x17f   :  { %449 = vmatmul.mubr.f32.vlgmr.msra.gmra.mrb[0].mxu1 %v350_v54 }
 0x180   :  { %1307 = vmatpush1.bf16.msra.mxu1 %v2069_v2  ;;  %v465_v2 = vunpack.c.0.s8 %v464_v60  ;;  %v2132_v60 = vld [vmem:[#allocation2 + $0xa0] ss:$8 sps:$4 sm:$0xff]  }
 0x181   :  { %1308 = vmatprep.subr.bf16.mxu1 %v2077_v8 }
 0x182   :  { %v2676_v6 = vsub.s32 %v465_v2, %v2673_v3  ;;  %v2138_v2 = vld [vmem:[#allocation2 + $0xb0] ss:$8 sps:$4 sm:$0xff]  }
 0x184   :  { %1309 = vmatpush1.bf16.msra.mxu1 %v2075_v9 }
 0x185   :  { %1310 = vmatprep.subr.bf16.mxu1 %v2083_v11 }
 0x188   :  { %1311 = vmatpush1.bf16.msra.mxu1 %v2081_v12  ;;  %v459_v12 = vld [vmem:[%s2866_s2] sm:$0x1] }
 0x189   :  { %1312 = vmatprep.subr.bf16.mxu1 %v2089_v14 }
 0x18c   :  { %1313 = vmatpush1.bf16.msra.mxu1 %v2087_v15 }
 0x18d   :  { %1314 = vmatprep.subr.bf16.mxu1 %v2095_v17  ;;  %v480_v17 = vld [vmem:[%s2867_s3] sm:$0x1] }
 0x190   :  { %1315 = vmatpush1.bf16.msra.mxu1 %v2093_v18 }
 0x191   :  { %1316 = vmatprep.subr.bf16.mxu1 %v2101_v20  ;;  %v2687_v20 = vsub.s32 0, %v2673_v3 }
 0x194   :  { %1317 = vmatpush1.bf16.msra.mxu1 %v2099_v21 }
 0x195   :  { %1318 = vmatprep.subr.bf16.mxu1 %v2107_v23 }
 0x198   :  { %1319 = vmatpush1.bf16.msra.mxu1 %v2105_v24  ;;  %v2072_v24 = vld [vmem:[#allocation2] ss:$8 sps:$4 sm:$0xff]  }
 0x199   :  { %1320 = vmatprep.subr.bf16.mxu1 %v2113_v26  ;;  %v2080_v26 = vld [vmem:[#allocation2 + $0x14] ss:$8 sps:$4 sm:$0xff]  }
 0x19c   :  { %1321 = vmatpush1.bf16.msra.mxu1 %v2111_v27 }
 0x19d   :  { %1322 = vmatprep.subr.bf16.mxu1 %v2119_v29  ;;  %v2078_v29 = vld [vmem:[#allocation2 + $0x10] ss:$8 sps:$4 sm:$0xff]  }
 0x1a0   :  { %1323 = vmatpush1.bf16.msra.mxu1 %v2117_v30  ;;  %v2086_v30 = vld [vmem:[#allocation2 + $0x24] ss:$8 sps:$4 sm:$0xff]  }
 0x1a1   :  { %1324 = vmatprep.subr.bf16.mxu1 %v2125_v32  ;;  %v2084_v32 = vld [vmem:[#allocation2 + $0x20] ss:$8 sps:$4 sm:$0xff]  }
 0x1a4   :  { %1325 = vmatpush1.bf16.msra.mxu1 %v2123_v33  ;;  %v2092_v33 = vld [vmem:[#allocation2 + $0x34] ss:$8 sps:$4 sm:$0xff]  }
 0x1a5   :  { %1326 = vmatprep.subr.bf16.mxu1 %v2131_v34  ;;  %v2090_v34 = vld [vmem:[#allocation2 + $0x30] ss:$8 sps:$4 sm:$0xff]  }
 0x1a8   :  { %1327 = vmatpush1.bf16.msra.mxu1 %v2129_v36  ;;  %v2098_v36 = vld [vmem:[#allocation2 + $0x44] ss:$8 sps:$4 sm:$0xff]  }
 0x1a9   :  { %1328 = vmatprep.subr.bf16.mxu1 %v2137_v37  ;;  %v2096_v37 = vld [vmem:[#allocation2 + $0x40] ss:$8 sps:$4 sm:$0xff]  }
 0x1ac   :  { %1329 = vmatpush1.bf16.msra.mxu1 %v2135_v40  ;;  %v2104_v40 = vld [vmem:[#allocation2 + $0x54] ss:$8 sps:$4 sm:$0xff]  }
 0x1ad   :  { %1330 = vmatprep.subr.bf16.mxu1 %v2143_v43  ;;  %v2102_v43 = vld [vmem:[#allocation2 + $0x50] ss:$8 sps:$4 sm:$0xff]  }
 0x1b0   :  { %1331 = vmatpush1.bf16.msra.mxu1 %v2141_v44  ;;  %v2110_v44 = vld [vmem:[#allocation2 + $0x64] ss:$8 sps:$4 sm:$0xff]  }
 0x252   :  { %v1887_v49 = vpop.f32.mrb[0].mxu1 }
 0x253   :  { %v1888_v50 = vpop.f32.mrb[1].mxu1 }
 0x254   :  { %v1889_v51 = vadd.f32 %v1888_v50, %v1887_v49  ;;  %v2108_v49 = vld [vmem:[#allocation2 + $0x60] ss:$8 sps:$4 sm:$0xff]   ;;  %v2116_v50 = vld [vmem:[#allocation2 + $0x74] ss:$8 sps:$4 sm:$0xff]  }
 0x256   :  { %v454_v53 = vmul.f32 %v1889_v51, %v1889_v51 }
 0x258   :  { %v456_v54 = vrot.slane %v454_v53, 7  ;;  %v2122_v53 = vld [vmem:[#allocation2 + $0x84] ss:$8 sps:$4 sm:$0xff]  }
 0x25a   :  { %v458_v55 = vsub.f32 %v1889_v51, %v456_v54  ;;  %v2120_v54 = vld [vmem:[#allocation2 + $0x80] ss:$8 sps:$4 sm:$0xff]  }
 0x25c   :  { %v460_v56 = vadd.f32 1e-05, %v458_v55  ;;  %v2128_v55 = vld [vmem:[#allocation2 + $0x94] ss:$8 sps:$4 sm:$0xff]  }
 0x25e   :  { %2213 = vrsqrt.f32 %v460_v56  ;;  %v2126_v56 = vld [vmem:[#allocation2 + $0x90] ss:$8 sps:$4 sm:$0xff]  }
 0x268   :  { %v2214_v8 = vpop.eup %2213 }
 0x269   :  { %v469_v9 = vrot.slane %v2214_v8, %v2676_v6  ;;  %v2146_v8 = vld [vmem:[#allocation2 + $0xc4] ss:$8 sps:$4 sm:$0xff]  }
 0x26b   :  { %v470_v11 = vcombine.high %v469_v9, %v469_v9  ;;  %v2149_v9 = vld [vmem:[#allocation2 + $0x1d4] ss:$8 sps:$4 sm:$0xff]  }
 0x26c   :  { %1332 = vmatprep.subr.bf16.mxu1 %v2149_v9 }
 0x26d   :  { %v477_v14 = vrot.slane %v470_v11, %v2676_v6  ;;  %v2144_v11 = vld [vmem:[#allocation2 + $0xc0] ss:$8 sps:$4 sm:$0xff]  }
 0x26f   :  { %v479_v15 = vmul.f32 %v477_v14, %v459_v12  ;;  %v2147_v12 = vld [vmem:[#allocation2 + $0x1d0] ss:$8 sps:$4 sm:$0xff]   ;;  %v2152_v14 = vld [vmem:[#allocation2 + $0xd4] ss:$8 sps:$4 sm:$0xff]  }
 0x270   :  { %1333 = vmatpush1.bf16.msra.mxu1 %v2147_v12 }
 0x271   :  { %v481_v18 = vmul.f32 %v1889_v51, %v479_v15  ;;  %v2114_v51 = vld [vmem:[#allocation2 + $0x70] ss:$8 sps:$4 sm:$0xff]  }
 0x273   :  { %v482_v21 = vsub.f32 %v480_v17, %v481_v18  ;;  %v2150_v17 = vld [vmem:[#allocation2 + $0xd0] ss:$8 sps:$4 sm:$0xff]   ;;  %v2153_v18 = vld [vmem:[#allocation2 + $0x1e0] ss:$8 sps:$4 sm:$0xff]  }
 0x275   :  { %v487_v23 = vrot.slane %v482_v21, %v2687_v20  ;;  %v2158_v21 = vld [vmem:[#allocation2 + $0xe4] ss:$8 sps:$4 sm:$0xff]  }
 0x277   :  { %v489_v27 = vsel %vm56_vm1, %v479_v15, %v487_v23  ;;  %v2155_v15 = vld [vmem:[#allocation2 + $0x1e4] ss:$8 sps:$4 sm:$0xff]   ;;  %v2161_v23 = vld [vmem:[#allocation2 + $0x1f4] ss:$8 sps:$4 sm:$0xff]  }
 0x278   :  { %1729 = vmatmul.mubr.msk.f32.vlgmr.msra.gmra.mrb[8].mxu0 %vm494_vm3, %v489_v27  ;;  %1334 = vmatprep.subr.bf16.mxu1 %v2155_v15  ;;  %v2164_v27 = vld [vmem:[#allocation2 + $0xf4] ss:$8 sps:$4 sm:$0xff]  }
 0x279   :  { %1254 = vmatpush1.bf16.msra.mxu0 %v2072_v24  ;;  %1335 = vmatpush1.bf16.msra.mxu1 %v2153_v18  ;;  %v2156_v24 = vld [vmem:[#allocation2 + $0xe0] ss:$8 sps:$4 sm:$0xff]  }
 0x27a   :  { %1255 = vmatprep.subr.bf16.mxu0 %v2080_v26  ;;  %v2159_v26 = vld [vmem:[#allocation2 + $0x1f0] ss:$8 sps:$4 sm:$0xff]   ;;  %1336 = vmatprep.subr.bf16.mxu1 %v2161_v23 }
 0x27d   :  { %1256 = vmatpush1.bf16.msra.mxu0 %v2078_v29  ;;  %1337 = vmatpush1.bf16.msra.mxu1 %v2159_v26  ;;  %v2167_v29 = vld [vmem:[#allocation2 + $0x204] ss:$8 sps:$4 sm:$0xff]  }
 0x27e   :  { %1257 = vmatprep.subr.bf16.mxu0 %v2086_v30  ;;  %v2162_v30 = vld [vmem:[#allocation2 + $0xf0] ss:$8 sps:$4 sm:$0xff]   ;;  %1359 = vmatprep.subr.bf16.mxu1 %v2167_v29 }
 0x281   :  { %1258 = vmatpush1.bf16.msra.mxu0 %v2084_v32  ;;  %v2694_v32 = vsub.s32 1, %v2673_v3 }
 0x282   :  { %1259 = vmatprep.subr.bf16.mxu0 %v2092_v33 }
 0x285   :  { %1260 = vmatpush1.bf16.msra.mxu0 %v2090_v34 }
 0x286   :  { %1261 = vmatprep.subr.bf16.mxu0 %v2098_v36 }
 0x289   :  { %1262 = vmatpush1.bf16.msra.mxu0 %v2096_v37 }
 0x28a   :  { %1263 = vmatprep.subr.bf16.mxu0 %v2104_v40 }
 0x28d   :  { %1264 = vmatpush1.bf16.msra.mxu0 %v2102_v43 }
 0x28e   :  { %1265 = vmatprep.subr.bf16.mxu0 %v2110_v44 }
 0x291   :  { %1266 = vmatpush1.bf16.msra.mxu0 %v2108_v49 }
 0x292   :  { %1267 = vmatprep.subr.bf16.mxu0 %v2116_v50 }
 0x295   :  { %1268 = vmatpush1.bf16.msra.mxu0 %v2114_v51 }
 0x296   :  { %1269 = vmatprep.subr.bf16.mxu0 %v2122_v53 }
 0x299   :  { %1270 = vmatpush1.bf16.msra.mxu0 %v2120_v54 }
 0x29a   :  { %1271 = vmatprep.subr.bf16.mxu0 %v2128_v55 }
 0x29d   :  { %1272 = vmatpush1.bf16.msra.mxu0 %v2126_v56 }
 0x29e   :  { %1273 = vmatprep.subr.bf16.mxu0 %v2134_v57 }
 0x2a1   :  { %1274 = vmatpush1.bf16.msra.mxu0 %v2132_v60 }
 0x2a2   :  { %1275 = vmatprep.subr.bf16.mxu0 %v2140_v62 }
 0x2a5   :  { %1276 = vmatpush1.bf16.msra.mxu0 %v2138_v2 }
 0x2a6   :  { %1277 = vmatprep.subr.bf16.mxu0 %v2146_v8 }
 0x2a9   :  { %1278 = vmatpush1.bf16.msra.mxu0 %v2144_v11 }
 0x2aa   :  { %1279 = vmatprep.subr.bf16.mxu0 %v2152_v14 }
 0x2ad   :  { %1280 = vmatpush1.bf16.msra.mxu0 %v2150_v17  ;;  %v2185_v17 = vld [vmem:[#allocation2 + $0x264] ss:$8 sps:$4 sm:$0xff]  }
 0x2ae   :  { %1281 = vmatprep.subr.bf16.mxu0 %v2158_v21  ;;  %v2165_v21 = vld [vmem:[#allocation2 + $0x200] ss:$8 sps:$4 sm:$0xff]  }
 0x2b1   :  { %1282 = vmatpush1.bf16.msra.mxu0 %v2156_v24 }
 0x2b2   :  { %1283 = vmatprep.subr.bf16.mxu0 %v2164_v27 }
 0x2b5   :  { %1284 = vmatpush1.bf16.msra.mxu0 %v2162_v30  ;;  %v2170_v30 = vld [vmem:[#allocation2 + $0x214] ss:$8 sps:$4 sm:$0xff]  }
 0x2b6   :  { %1962 = vmatprep.subr.bf16.mxu0 %v2428_v38 }
 0x34b   :  { %v564_v33 = vpop.f32.mrb[8].mxu0 }
 0x34c   :  { %v572_v34 = vrot.slane %v564_v33, %v2687_v20  ;;  %v566_v36 = vpop.f32.mrb[9].mxu0  ;;  %v588_v37 = vrot.slane %v564_v33, %v2694_v32 }
 0x34d   :  { %v576_v40 = vrot.slane %v566_v36, %v2687_v20  ;;  %v592_v43 = vrot.slane %v566_v36, %v2694_v32 }
 0x34e   :  { %v577_v44 = vmul.f32 %v572_v34, %v2612_v46  ;;  %v579_v49 = vmul.f32 %v572_v34, %v2616_v48  ;;  %v581_v50 = vmul.f32 %v572_v34, %v2632_v58  ;;  %v583_v38 = vmul.f32 %v572_v34, %v2642_v0 }
 0x34f   :  { %v578_v3 = vmul.f32 %v576_v40, %v2614_v47  ;;  %v580_v51 = vmul.f32 %v576_v40, %v2624_v52  ;;  %v582_v53 = vmul.f32 %v576_v40, %v2637_v61  ;;  %v584_v54 = vmul.f32 %v576_v40, %v2647_v5 }
 0x350   :  { %v593_v55 = vadd.f32 %v588_v37, %v577_v44  ;;  %v595_v56 = vadd.f32 %v588_v37, %v579_v49  ;;  %v597_v57 = vadd.f32 %v588_v37, %v581_v50  ;;  %v599_v60 = vadd.f32 %v588_v37, %v583_v38 }
 0x351   :  { %v594_v62 = vadd.f32 %v592_v43, %v578_v3  ;;  %v596_v46 = vadd.f32 %v592_v43, %v580_v51  ;;  %v598_v2 = vadd.f32 %v592_v43, %v582_v53  ;;  %v600_v48 = vadd.f32 %v592_v43, %v584_v54  ;;  %v2168_v53 = vld [vmem:[#allocation2 + $0x210] ss:$8 sps:$4 sm:$0xff]  }
 0x352   :  { %v601_v8 = vmax.f32 %v593_v55, 0.0  ;;  %v603_v58 = vmax.f32 %v595_v56, 0.0  ;;  %v2708_v9 = vmax.f32 %v597_v57, 0.0  ;;  %v2710_v0 = vmax.f32 %v599_v60, 0.0  ;;  %v2173_v57 = vld [vmem:[#allocation2 + $0x224] ss:$8 sps:$4 sm:$0xff]  }
 0x353   :  { %v602_v47 = vmax.f32 %v594_v62, 0.0  ;;  %v604_v52 = vmax.f32 %v596_v46, 0.0  ;;  %v606_v11 = vmax.f32 %v598_v2, 0.0  ;;  %v608_v61 = vmax.f32 %v600_v48, 0.0 }
 0x354   :  { %v619_v12 = vrot.slane %v603_v58, 7  ;;  %v641_v5 = vrot.slane %v601_v8, 1  ;;  %v642_v14 = vrot.slane %v603_v58, 1  ;;  %v667_v15 = vpack.c.bf16 %v603_v58, %v601_v8 }
 0x355   :  { %v668_v18 = vpack.c.bf16 %v604_v52, %v602_v47  ;;  %v674_v23 = vpack.c.bf16 %v608_v61, %v606_v11  ;;  %v618_v24 = vrot.slane %v602_v47, 7  ;;  %v621_v26 = vrot.slane %v604_v52, 7 }
 0x356   :  { %v643_v27 = vsel %vm69_vm0, %v641_v5, %v642_v14  ;;  %v617_v29 = vrot.slane %v601_v8, 7  ;;  %v624_v33 = vrot.slane %v606_v11, 7  ;;  %v627_v34 = vrot.slane %v608_v61, 7 }
 0x357   :  { %v2718_v36 = vpack.c.bf16 %v642_v14, %v643_v27  ;;  %1338 = vmatprep.mubr.bf16.mxu1 %v668_v18  ;;  %v622_v37 = vsel %vm56_vm1, %v618_v24, %v621_v26  ;;  %v673_v43 = vpack.c.bf16 %v2710_v0, %v2708_v9  ;;  %v644_v44 = vrot.slane %v602_v47, 1  ;;  %v2177_v14 = vld [vmem:[#allocation2 + $0x240] ss:$8 sps:$4 sm:$0xff]   ;;  %v2200_v18 = vld [vmem:[#allocation2 + $0x2b4] ss:$8 sps:$4 sm:$0xff]  }
 0x358   :  { %1339 = vmatmul.mubr.bf16.vlgmr.msra.gmra.mrb[4].mxu1 %v667_v15  ;;  %v1828_v49 = vpack.c.bf16 %v622_v37, %v618_v24  ;;  %v620_v50 = vsel %vm56_vm1, %v617_v29, %v619_v12  ;;  %v628_v38 = vsel %vm56_vm1, %v624_v33, %v627_v34  ;;  %v645_v3 = vrot.slane %v604_v52, 1  ;;  %v2176_v12 = vld [vmem:[#allocation2 + $0x234] ss:$8 sps:$4 sm:$0xff]   ;;  %v2180_v15 = vld [vmem:[#allocation2 + $0x250] ss:$8 sps:$4 sm:$0xff]  }
 0x359   :  { %1360 = vmatpush1.bf16.msra.mxu1 %v2165_v21  ;;  %1348 = vmatprep.mubr.bf16.mxu1 %v674_v23  ;;  %v1832_v51 = vpack.c.bf16 %v620_v50, %v617_v29  ;;  %v1836_v54 = vpack.c.bf16 %v628_v38, %v624_v33  ;;  %v623_v55 = vrot.slane %v2708_v9, 7  ;;  %v625_v56 = vrot.slane %v2710_v0, 7  ;;  %v2203_v21 = vld [vmem:[#allocation2 + $0x2c4] ss:$8 sps:$4 sm:$0xff]   ;;  %v2206_v23 = vld [vmem:[#allocation2 + $0x2d4] ss:$8 sps:$4 sm:$0xff]  }
 0x35a   :  { %1829 = vmatprep.mubr.msk.bf16.mxu0 %vm2724_vm6, %v1828_v49  ;;  %1361 = vmatprep.subr.bf16.mxu1 %v2170_v30  ;;  %v646_v60 = vsel %vm69_vm0, %v644_v44, %v645_v3  ;;  %v650_v62 = vrot.slane %v606_v11, 1  ;;  %v651_v46 = vrot.slane %v608_v61, 1  ;;  %v647_v2 = vrot.slane %v2708_v9, 1  ;;  %v2171_v11 = vld [vmem:[#allocation2 + $0x220] ss:$8 sps:$4 sm:$0xff]  }
 0x35b   :  { %1833 = vmatmul.mubr.msk.bf16.vlgmr.msra.gmra.mrb[12].mxu0 %vm2724_vm6, %v1832_v51  ;;  %v1843_v48 = vpack.c.bf16 %v645_v3, %v646_v60  ;;  %v626_v8 = vsel %vm56_vm1, %v623_v55, %v625_v56  ;;  %v648_v58 = vrot.slane %v2710_v0, 1  ;;  %v2209_v24 = vld [vmem:[#allocation2 + $0x2e4] ss:$8 sps:$4 sm:$0xff]   ;;  %v2212_v26 = vld [vmem:[#allocation2 + $0x2f4] ss:$8 sps:$4 sm:$0xff]  }
 0x35c   :  { %1837 = vmatprep.mubr.msk.bf16.mxu0 %vm2724_vm6, %v1836_v54  ;;  %v1840_v47 = vpack.c.bf16 %v626_v8, %v623_v55  ;;  %v652_v52 = vsel %vm69_vm0, %v650_v62, %v651_v46  ;;  %1964 = vmatpush3.bf16.msra.mxu0 %v2430_v39  ;;  %v2174_v39 = vld [vmem:[#allocation2 + $0x230] ss:$8 sps:$4 sm:$0xff]  }
 0x35d   :  { %1362 = vmatpush1.bf16.msra.mxu1 %v2168_v53  ;;  %v2746_v61 = vpack.c.bf16 %v651_v46, %v652_v52  ;;  %v649_v9 = vsel %vm69_vm0, %v647_v2, %v648_v58  ;;  %1966 = vmatprep.subr.bf16.mxu0 %v2492_v4  ;;  %v2179_v4 = vld [vmem:[#allocation2 + $0x244] ss:$8 sps:$4 sm:$0xff]   ;;  %v2210_v27 = vld [vmem:[#allocation2 + $0x2f0] ss:$8 sps:$4 sm:$0xff]  }
 0x35e   :  { %1363 = vmatprep.subr.bf16.mxu1 %v2173_v57  ;;  %v2756_v5 = vpack.c.bf16 %v648_v58, %v649_v9 }
 0x360   :  { %1349 = vmatmul.mubr.bf16.gmra.mrb[8].mxu1 %v673_v43  ;;  %1968 = vmatpush3.bf16.msra.mxu0 %v2500_v7  ;;  %v2182_v7 = vld [vmem:[#allocation2 + $0x254] ss:$8 sps:$4 sm:$0xff]  }
 0x361   :  { %1364 = vmatpush1.bf16.msra.mxu1 %v2171_v11  ;;  %1844 = vmatprep.mubr.msk.bf16.mxu1 %vm2752_vm7, %v1843_v48 }
 0x362   :  { %1365 = vmatprep.subr.bf16.mxu1 %v2176_v12  ;;  %1970 = vmatprep.subr.bf16.mxu0 %v2510_v10  ;;  %v2183_v10 = vld [vmem:[#allocation2 + $0x260] ss:$8 sps:$4 sm:$0xff]  }
 0x363   :  { %1841 = vmatmul.mubr.msk.bf16.gmra.mrb[16].mxu0 %vm2724_vm6, %v1840_v47 }
 0x364   :  { %1972 = vmatpush3.bf16.msra.mxu0 %v2518_v13  ;;  %v2188_v13 = vld [vmem:[#allocation2 + $0x274] ss:$8 sps:$4 sm:$0xff]  }
 0x365   :  { %1366 = vmatpush1.bf16.msra.mxu1 %v2174_v39  ;;  %1974 = vmatprep.subr.bf16.mxu0 %v2528_v16  ;;  %v2186_v16 = vld [vmem:[#allocation2 + $0x270] ss:$8 sps:$4 sm:$0xff]  }
 0x366   :  { %1367 = vmatprep.subr.bf16.mxu1 %v2179_v4 }
 0x368   :  { %1976 = vmatpush3.bf16.msra.mxu0 %v2536_v19  ;;  %v2191_v19 = vld [vmem:[#allocation2 + $0x284] ss:$8 sps:$4 sm:$0xff]  }
 0x369   :  { %1368 = vmatpush1.bf16.msra.mxu1 %v2177_v14  ;;  %1978 = vmatprep.subr.bf16.mxu0 %v2546_v22  ;;  %v2189_v22 = vld [vmem:[#allocation2 + $0x280] ss:$8 sps:$4 sm:$0xff]  }
 0x36a   :  { %1369 = vmatprep.subr.bf16.mxu1 %v2182_v7 }
 0x36c   :  { %1980 = vmatpush3.bf16.msra.mxu0 %v2554_v25  ;;  %v2194_v25 = vld [vmem:[#allocation2 + $0x294] ss:$8 sps:$4 sm:$0xff]  }
 0x36d   :  { %1370 = vmatpush1.bf16.msra.mxu1 %v2180_v15  ;;  %1982 = vmatprep.subr.bf16.mxu0 %v2564_v28  ;;  %v2192_v28 = vld [vmem:[#allocation2 + $0x290] ss:$8 sps:$4 sm:$0xff]  }
 0x36e   :  { %1371 = vmatprep.subr.bf16.mxu1 %v2185_v17 }
 0x370   :  { %1984 = vmatpush3.bf16.msra.mxu0 %v2572_v31  ;;  %v2197_v31 = vld [vmem:[#allocation2 + $0x2a4] ss:$8 sps:$4 sm:$0xff]  }
 0x371   :  { %1372 = vmatpush1.bf16.msra.mxu1 %v2183_v10  ;;  %1986 = vmatprep.subr.bf16.mxu0 %v2585_v35  ;;  %v2195_v35 = vld [vmem:[#allocation2 + $0x2a0] ss:$8 sps:$4 sm:$0xff]  }
 0x372   :  { %1373 = vmatprep.subr.bf16.mxu1 %v2188_v13 }
 0x374   :  { %1988 = vmatpush3.bf16.msra.mxu0 %v2596_v41  ;;  %v2198_v41 = vld [vmem:[#allocation2 + $0x2b0] ss:$8 sps:$4 sm:$0xff]  }
 0x375   :  { %1374 = vmatpush1.bf16.msra.mxu1 %v2186_v16  ;;  %1990 = vmatprep.subr.bf16.mxu0 %v2598_v42  ;;  %v2201_v42 = vld [vmem:[#allocation2 + $0x2c0] ss:$8 sps:$4 sm:$0xff]  }
 0x376   :  { %1375 = vmatprep.subr.bf16.mxu1 %v2191_v19 }
 0x378   :  { %1992 = vmatpush3.bf16.msra.mxu0 %v2608_v45  ;;  %v2204_v45 = vld [vmem:[#allocation2 + $0x2d0] ss:$8 sps:$4 sm:$0xff]  }
 0x379   :  { %1376 = vmatpush1.bf16.msra.mxu1 %v2189_v22  ;;  %1994 = vmatprep.subr.bf16.mxu0 %v2660_v59  ;;  %v2207_v59 = vld [vmem:[#allocation2 + $0x2e0] ss:$8 sps:$4 sm:$0xff]  }
 0x37a   :  { %1377 = vmatprep.subr.bf16.mxu1 %v2194_v25 }
 0x37d   :  { %1378 = vmatpush1.bf16.msra.mxu1 %v2192_v28 }
 0x37e   :  { %1379 = vmatprep.subr.bf16.mxu1 %v2197_v31 }
 0x381   :  { %1380 = vmatpush1.bf16.msra.mxu1 %v2195_v35 }
 0x382   :  { %1381 = vmatprep.subr.bf16.mxu1 %v2200_v18 }
 0x385   :  { %1382 = vmatpush1.bf16.msra.mxu1 %v2198_v41 }
 0x386   :  { %1383 = vmatprep.subr.bf16.mxu1 %v2203_v21 }
 0x389   :  { %1384 = vmatpush1.bf16.msra.mxu1 %v2201_v42 }
 0x38a   :  { %1385 = vmatprep.subr.bf16.mxu1 %v2206_v23 }
 0x38d   :  { %1386 = vmatpush1.bf16.msra.mxu1 %v2204_v45 }
 0x38e   :  { %1387 = vmatprep.subr.bf16.mxu1 %v2209_v24 }
 0x391   :  { %1388 = vmatpush1.bf16.msra.mxu1 %v2207_v59 }
 0x392   :  { %1389 = vmatprep.subr.bf16.mxu1 %v2212_v26 }
 0x395   :  { %1390 = vmatpush1.bf16.msra.mxu1 %v2210_v27 }
 0x398   :  { %1847 = vmatmul.mubr.msk.bf16.vlgmr.msra.gmra.mrb[4].mxu1 %vm2752_vm7, %v2718_v36 }
 0x399   :  { %1850 = vmatprep.mubr.msk.bf16.mxu1 %vm2752_vm7, %v2746_v61 }
 0x3a0   :  { %1853 = vmatmul.mubr.msk.bf16.gmra.mrb[8].mxu1 %vm2752_vm7, %v2756_v5 }
 0x42e   :  { %v1287_v29 = vpop.f32.mrb[12].mxu0 }
 0x42f   :  { %v1289_v30 = vpop.f32.mrb[13].mxu0 }
 0x430   :  { %v1291_v33 = vpop.f32.mrb[14].mxu0 }
 0x431   :  { %v1293_v34 = vpop.f32.mrb[15].mxu0 }
 0x436   :  { %v1297_v37 = vpop.f32.mrb[16].mxu0 }
 0x437   :  { %v1299_v40 = vpop.f32.mrb[17].mxu0 }
 0x438   :  { %v1301_v43 = vpop.f32.mrb[18].mxu0 }
 0x439   :  { %v1303_v44 = vpop.f32.mrb[19].mxu0 }
 0x46b   :  { %v1393_v49 = vpop.f32.mrb[4].mxu1 }
 0x46c   :  { %v2785_v50 = vadd.f32 %v1393_v49, %v1287_v29  ;;  %v1395_v36 = vpop.f32.mrb[5].mxu1 }
 0x46d   :  { %v2787_v38 = vadd.f32 %v1395_v36, %v1289_v30  ;;  %v1397_v3 = vpop.f32.mrb[6].mxu1 }
 0x46e   :  { %v2789_v51 = vadd.f32 %v1397_v3, %v1291_v33  ;;  %v1399_v53 = vpop.f32.mrb[7].mxu1  ;;  %v1430_v60 = vmul.f32 %v2785_v50, %v2785_v50 }
 0x46f   :  { %v2791_v54 = vadd.f32 %v1399_v53, %v1293_v34  ;;  %v1431_v48 = vmul.f32 %v2787_v38, %v2787_v38 }
 0x470   :  { %v1432_v55 = vmul.f32 %v2789_v51, %v2789_v51  ;;  %v1412_v62 = vadd.f32 %v2789_v51, %v2785_v50 }
 0x471   :  { %v1433_v56 = vmul.f32 %v2791_v54, %v2791_v54  ;;  %v1421_v8 = vadd.f32 %v2791_v54, %v2787_v38 }
 0x472   :  { %v1438_v52 = vadd.f32 %v1432_v55, %v1430_v60 }
 0x473   :  { %v1403_v57 = vpop.f32.mrb[8].mxu1  ;;  %v1447_v12 = vadd.f32 %v1433_v56, %v1431_v48 }
 0x474   :  { %v2801_v46 = vadd.f32 %v1403_v57, %v1297_v37  ;;  %v1405_v2 = vpop.f32.mrb[9].mxu1 }
 0x475   :  { %v2807_v58 = vadd.f32 %v1405_v2, %v1299_v40  ;;  %v1407_v47 = vpop.f32.mrb[10].mxu1 }
 0x476   :  { %v1413_v11 = vadd.f32 %v2801_v46, %v1412_v62  ;;  %v1434_v61 = vmul.f32 %v2801_v46, %v2801_v46  ;;  %v2812_v9 = vadd.f32 %v1407_v47, %v1301_v43  ;;  %v1409_v0 = vpop.f32.mrb[11].mxu1 }
 0x477   :  { %v1422_v5 = vadd.f32 %v2807_v58, %v1421_v8  ;;  %v1435_v39 = vmul.f32 %v2807_v58, %v2807_v58  ;;  %v2817_v4 = vadd.f32 %v1409_v0, %v1303_v44 }
 0x478   :  { %v1439_v14 = vadd.f32 %v1438_v52, %v1434_v61  ;;  %v1414_v7 = vadd.f32 %v2812_v9, %v1413_v11  ;;  %v1436_v15 = vmul.f32 %v2812_v9, %v2812_v9  ;;  %v1533_v52 = vld [vmem:[%s2869_s5] sm:$0x1]  ;;  %s2272_s5 = smov [#allocation5]  }
 0x479   :  { %v1448_v17 = vadd.f32 %v1447_v12, %v1435_v39  ;;  %v1423_v10 = vadd.f32 %v2817_v4, %v1422_v5  ;;  %v1437_v13 = vmul.f32 %v2817_v4, %v2817_v4 }
 0x47a   :  { %v1415_v16 = vrot.slane %v1414_v7, 4  ;;  %v1440_v19 = vadd.f32 %v1439_v14, %v1436_v15 }
 0x47b   :  { %v1424_v22 = vrot.slane %v1423_v10, 4  ;;  %v1449_v25 = vadd.f32 %v1448_v17, %v1437_v13 }
 0x47c   :  { %v1416_v28 = vadd.f32 %v1415_v16, %v1414_v7  ;;  %v1441_v31 = vrot.slane %v1440_v19, 4 }
 0x47d   :  { %v1425_v35 = vadd.f32 %v1424_v22, %v1423_v10  ;;  %v1450_v18 = vrot.slane %v1449_v25, 4 }
 0x47e   :  { %v1417_v41 = vrot.slane %v1416_v28, 2  ;;  %v1442_v21 = vadd.f32 %v1441_v31, %v1440_v19 }
 0x47f   :  { %v1426_v42 = vrot.slane %v1425_v35, 2  ;;  %v1451_v23 = vadd.f32 %v1450_v18, %v1449_v25 }
 0x480   :  { %v1418_v45 = vadd.f32 %v1417_v41, %v1416_v28  ;;  %v1443_v24 = vrot.slane %v1442_v21, 2 }
 0x481   :  { %v1427_v59 = vadd.f32 %v1426_v42, %v1425_v35  ;;  %v1452_v26 = vrot.slane %v1451_v23, 2 }
 0x482   :  { %v1444_v27 = vadd.f32 %v1443_v24, %v1442_v21  ;;  %v1419_v33 = vrot.slane %v1418_v45, 1 }
 0x483   :  { %v1428_v29 = vrot.slane %v1427_v59, 1  ;;  %v1453_v30 = vadd.f32 %v1452_v26, %v1451_v23 }
 0x484   :  { %v1445_v34 = vrot.slane %v1444_v27, 1  ;;  %v1420_v49 = vadd.f32 %v1419_v33, %v1418_v45 }
 0x485   :  { %v1454_v37 = vrot.slane %v1453_v30, 1  ;;  %v1429_v43 = vadd.f32 %v1428_v29, %v1427_v59 }
 0x486   :  { %v1446_v40 = vadd.f32 %v1445_v34, %v1444_v27 }
 0x487   :  { %v1455_v44 = vadd.f32 %v1454_v37, %v1453_v30 }
 0x488   :  { %v1456_v3 = vsel %vm56_vm1, %v1420_v49, %v1446_v40 }
 0x489   :  { %v1457_v36 = vsel %vm56_vm1, %v1429_v43, %v1455_v44 }
 0x48a   :  { %1522 = vmatprep.mubr.f32.mxu0 %v1457_v36 }
 0x48b   :  { %1523 = vmatmul.mubr.f32.vlgmr.msra.gmra.mrb[10].mxu0 %v1456_v3 }
 0x48c   :  { %1996 = vmatpush1.bf16.msra.mxu0 %v2668_v63  ;;  %1631 = vmatprep.mubr.f32.mxu0 %v2269_v1  ;;  %v1554_v1 = vld [vmem:[%s2870_s6] sm:$0x1]  ;;  %s1691_s6 = sshll.u32 %s2272_s5, 4  ;;  %s1692_s6 = int_to_ptr.vmem [resolvable:$true] %s1691_s6 }
 0x48d   :  { %s2239_s15 = scalar_lea.vmem %s1692_s6, 1024  ;;  %p2244_p9 = scmp.lt.s32.totalorder %s1692_s6, %s1692_s6 }
 0x48e   :  { %p2240_p8 = scmp.ne.s32.totalorder %s1692_s6, %s2239_s15  ;;  %p2245_p10 = scmp.lt.s32.totalorder %s2239_s15, %s2239_s15 }
 0x490   :  { %p2246_p11 = por %p2245_p10, %p2244_p9 }
 0x492   :  { %p2247_p12 = pnand %p2246_p11, %p2240_p8 }
 0x55e   :  { %v1922_v53 = vpop.f32.mrb[10].mxu0 }
 0x55f   :  { %v1923_v55 = vpop.f32.mrb[11].mxu0 }
 0x560   :  { %v1924_v56 = vadd.f32 %v1923_v55, %v1922_v53 }
 0x562   :  { %v1528_v57 = vmul.f32 %v1924_v56, %v1924_v56 }
 0x564   :  { %v1530_v60 = vrot.slane %v1528_v57, 7 }
 0x566   :  { %v1532_v62 = vsub.f32 %v1924_v56, %v1530_v60 }
 0x568   :  { %v1534_v2 = vadd.f32 1e-05, %v1532_v62 }
 0x56a   :  { %2215 = vrsqrt.f32 %v1534_v2 }
 0x574   :  { %v2216_v48 = vpop.eup %2215 }
 0x575   :  { %v1543_v8 = vrot.slane %v2216_v48, %v2676_v6 }
 0x577   :  { %v1544_v47 = vcombine.high %v1543_v8, %v1543_v8 }
 0x579   :  { %v1551_v63 = vrot.slane %v1544_v47, %v2676_v6 }
 0x57b   :  { %v1553_v11 = vmul.f32 %v1551_v63, %v1533_v52 }
 0x57d   :  { %v1555_v61 = vmul.f32 %v1924_v56, %v1553_v11 }
 0x57f   :  { %v1556_v0 = vsub.f32 %v1554_v1, %v1555_v61 }
 0x581   :  { %v1561_v12 = vrot.slane %v1556_v0, %v2687_v20 }
 0x583   :  { %v1563_v5 = vsel %vm56_vm1, %v1553_v11, %v1561_v12 }
 0x584   :  { %1854 = vmatmul.mubr.msk.f32.vlgmr.msra.gmra.mrb[20].mxu0 %vm494_vm3, %v1563_v5 }
 0x657   :  { %v1633_v39 = vpop.f32.mrb[20].mxu0 }
 0x658   :  { %v1641_v14 = vrot.slane %v1633_v39, %v2687_v20  ;;  %v1635_v7 = vpop.f32.mrb[21].mxu0  ;;  %v1657_v15 = vrot.slane %v1633_v39, %v2694_v32 }
 0x659   :  { %v1645_v6 = vrot.slane %v1635_v7, %v2687_v20  ;;  %v1661_v17 = vrot.slane %v1635_v7, %v2694_v32 }
 0x65a   :  { %v1646_v10 = vmul.f32 %v2785_v50, %v1641_v14  ;;  %v1648_v13 = vmul.f32 %v2789_v51, %v1641_v14  ;;  %v1650_v16 = vmul.f32 %v2801_v46, %v1641_v14  ;;  %v1652_v19 = vmul.f32 %v2812_v9, %v1641_v14 }
 0x65b   :  { %v1647_v22 = vmul.f32 %v2787_v38, %v1645_v6  ;;  %v1649_v25 = vmul.f32 %v2791_v54, %v1645_v6  ;;  %v1651_v28 = vmul.f32 %v2807_v58, %v1645_v6  ;;  %v1653_v31 = vmul.f32 %v2817_v4, %v1645_v6 }
 0x65c   :  { %v1662_v35 = vadd.f32 %v1657_v15, %v1646_v10  ;;  %v1664_v20 = vadd.f32 %v1657_v15, %v1648_v13  ;;  %v1666_v18 = vadd.f32 %v1657_v15, %v1650_v16  ;;  %v1668_v32 = vadd.f32 %v1657_v15, %v1652_v19 }
 0x65d   :  { %v1663_v50 = vadd.f32 %v1661_v17, %v1647_v22  ;;  %v1665_v51 = vadd.f32 %v1661_v17, %v1649_v25  ;;  %v1667_v41 = vadd.f32 %v1661_v17, %v1651_v28  ;;  %v1669_v46 = vadd.f32 %v1661_v17, %v1653_v31 }
 0x65e   :  { %v1670_v21 = vmax.f32 %v1662_v35, 0.0  ;;  %v1672_v9 = vmax.f32 %v1664_v20, 0.0  ;;  %v1674_v42 = vmax.f32 %v1666_v18, 0.0  ;;  %v1676_v38 = vmax.f32 %v1668_v32, 0.0 }
 0x65f   :  { %v1671_v23 = vmax.f32 %v1663_v50, 0.0  ;;  %v1673_v54 = vmax.f32 %v1665_v51, 0.0  ;;  %v1675_v45 = vmax.f32 %v1667_v41, 0.0  ;;  %v1677_v58 = vmax.f32 %v1669_v46, 0.0 }
 0x660   :  { %1678 = vst [vmem:[#allocation5] sm:$0xff] %v1670_v21  ;;  %1680 = vst [vmem:[#allocation5 + $0x10] sm:$0xff] %v1672_v9 }
 0x661   :  { %1682 = vst [vmem:[#allocation5 + $0x20] sm:$0xff] %v1674_v42  ;;  %1684 = vst [vmem:[#allocation5 + $0x30] sm:$0xff] %v1676_v38 }
 0x662   :  { %1679 = vst [vmem:[#allocation5 + $0x8] sm:$0xff] %v1671_v23  ;;  %1681 = vst [vmem:[#allocation5 + $0x18] sm:$0xff] %v1673_v54 }
 0x663   :  { %1683 = vst [vmem:[#allocation5 + $0x28] sm:$0xff] %v1675_v45  ;;  %1685 = vst [vmem:[#allocation5 + $0x38] sm:$0xff] %v1677_v58 }
 0x664   :  { %2250 = shalt.err (!%p2247_p12)
}
 0x665   :  { %s2251_s18 = scalar_lea.hbm %s2873_s9, 1024 }
 0x666   :  { %p2252_p13 = scmp.ne.s32.totalorder %s2873_s9, %s2251_s18  ;;  %p2255_p0 = scmp.lt.u32.totalorder %s2251_s18, %s2873_s9 }
 0x668   :  { %p2257_p1 = pnand %p2255_p0, %p2252_p13 }
 0x66a   :  { %2260 = shalt.err (!%p2257_p1)
}
 0x66b   :  { %s2273_s22 = smov 256   ;;  %s2274_s23 = smov 16  }
 0x66c   :  { %1697 = dma.vmem_to_hbm [thread:$0]  %s1692_s6, 1024, %s2873_s9, [#allocation4], %s2273_s22, %s2273_s22, %s2274_s23  }
 0x66d   :  { %2263 = dma.done.wait [#allocation4], 1024  }
 0x66e   :  { %2264 = vsyncadd [#allocation4], 4294966272 }
 0x66f   :  { %1701 = vsyncpa [#allocation3], 1 }
 0x670   :  { %1702 = vsyncpa [#allocation4], 1 }

</bundles_post_ra>
